<compile_context>
chip_gen: v7x
topology: tpu7x:2x2x1
jax: 0.10.0
libtpu: 0.0.40
codegen_flags: <defaults>
</compile_context>

<pallas_src>
import functools

import jax
import jax.numpy as jnp
from jax.experimental import pallas as pl
from jax.experimental.pallas import tpu as pltpu

_TM_MAX = 512  # max rows-per-tile for the fused matmul kernel


# ----------------------------------------------------------------------------
# Pallas kernel 1: fused (matmul -> bias -> optional ReLU)   (used by 1x1 conv)
# ----------------------------------------------------------------------------
def _fused_mm_kernel(x_ref, w_ref, b_ref, o_ref, *, relu):
    acc = jnp.dot(x_ref[...], w_ref[...], preferred_element_type=jnp.float32)
    acc = acc + b_ref[...]
    if relu:
        acc = jnp.maximum(acc, 0.0)
    o_ref[...] = acc.astype(o_ref.dtype)


def fused_matmul(x2d, w, bias, *, relu, out_dtype):
    """out[m, n] = maybe_relu(sum_k x2d[m, k] * w[k, n] + bias[n])."""
    M, K = x2d.shape
    Kw, N = w.shape
    assert K == Kw, (K, Kw)
    # Whole M in one block when it fits (single-block => no alignment rules);
    # otherwise 512-row tiles and Pallas masks the ragged tail. No pad/slice.
    tm = M if M <= _TM_MAX else _TM_MAX
    return pl.pallas_call(
        functools.partial(_fused_mm_kernel, relu=relu),
        out_shape=jax.ShapeDtypeStruct((M, N), out_dtype),
        grid=(pl.cdiv(M, tm),),
        in_specs=[
            pl.BlockSpec((tm, K), lambda i: (i, 0)),
            pl.BlockSpec((K, N), lambda i: (0, 0)),
            pl.BlockSpec((1, N), lambda i: (0, 0)),
        ],
        out_specs=pl.BlockSpec((tm, N), lambda i: (i, 0)),
        compiler_params=pltpu.CompilerParams(
            dimension_semantics=("parallel",)),
    )(x2d, w, bias.reshape(1, N))


# ----------------------------------------------------------------------------
# Pallas kernel 2: direct 3x3 conv (+ bias + optional ReLU), NHWC, no im2col
# ----------------------------------------------------------------------------
def _conv3x3_kernel(x_ref, w_ref, b_ref, o_ref, *, relu, h_stride):
    # x_ref: (Hp, Wp, Cin)  spatially padded image (bf16), resident in VMEM
    # w_ref: (3, 3, Cin, Cout) bf16
    # b_ref: (1, Cout) f32
    # o_ref: (Ho, Wout, Cout)  (Wout = Wp - 2; W-stride handled by the caller)
    ho, wout, cout = o_ref.shape
    bias = b_ref[...]  # (1, Cout) f32

    @pl.loop(0, ho)
    def _(oh):
        r0 = h_stride * oh
        acc = jnp.zeros((wout, cout), jnp.float32)
        for kh in range(3):
            row = x_ref[r0 + kh]                      # (Wp, Cin)
            for kw in range(3):
                acc = acc + jnp.dot(row[kw:kw + wout, :], w_ref[kh, kw],
                                    preferred_element_type=jnp.float32)
        acc = acc + bias
        if relu:
            acc = jnp.maximum(acc, 0.0)
        o_ref[oh] = acc.astype(o_ref.dtype)


def conv3x3(x, wgt, bias, *, stride, relu, out_dtype):
    """3x3 conv, padding=1, stride in {1,2}. x: (N,H,W,Cin) bf16 -> NHWC out."""
    n, h, w, c = x.shape
    cout = wgt.shape[-1]
    xp = jnp.pad(x, ((0, 0), (1, 1), (1, 1), (0, 0)))   # spatial halo
    ho = (h - 1) // stride + 1
    out = pl.pallas_call(
        functools.partial(_conv3x3_kernel, relu=relu, h_stride=stride),
        out_shape=jax.ShapeDtypeStruct((n, ho, w, cout), out_dtype),
        grid=(n,),
        in_specs=[
            pl.BlockSpec((None, h + 2, w + 2, c), lambda i: (i, 0, 0, 0)),
            pl.BlockSpec((3, 3, c, cout), lambda i: (0, 0, 0, 0)),
            pl.BlockSpec((1, cout), lambda i: (0, 0)),
        ],
        out_specs=pl.BlockSpec((None, ho, w, cout), lambda i: (i, 0, 0, 0)),
        compiler_params=pltpu.CompilerParams(
            dimension_semantics=("parallel",)),
    )(xp, wgt, bias.reshape(1, cout))
    if stride > 1:
        out = out[:, :, ::stride, :]   # W-stride via cheap output subsample
    return out


def conv1x1(x, wgt, bias, *, relu, out_dtype):
    n, h, w, c = x.shape
    y = fused_matmul(x.reshape(n * h * w, c), wgt, bias,
                     relu=relu, out_dtype=out_dtype)
    return y.reshape(n, h, w, -1)


# ----------------------------------------------------------------------------
# Deterministic parameter construction (BN scale folded into W, weights bf16)
# ----------------------------------------------------------------------------
_BN_EPS = 0.001


def _make_conv_bn(key, cin, cout, ksize):
    """Conv (no bias) + folded inference-mode BatchNorm -> (w_bf16, bias_f32)."""
    kw_, kg, kb = jax.random.split(key, 3)
    if ksize == 1:
        w = jax.random.normal(kw_, (cin, cout), jnp.float32) * 0.1
    else:
        w = jax.random.normal(kw_, (ksize, ksize, cin, cout), jnp.float32) * 0.1
    gamma = 1.0 + 0.1 * jax.random.normal(kg, (cout,), jnp.float32)
    beta = 0.1 * jax.random.normal(kb, (cout,), jnp.float32)
    mean = jnp.zeros((cout,), jnp.float32)   # BN running stats at init
    var = jnp.ones((cout,), jnp.float32)
    scale = gamma / jnp.sqrt(var + _BN_EPS)
    bias = beta - mean * scale
    return (w * scale).astype(jnp.bfloat16), bias  # fold scale into W


def _make_conv_bias(key, cin, cout, ksize):
    """Biased conv (predictor heads) -> (w_f32, bias_f32) before fusion."""
    kw_, kb = jax.random.split(key)
    w = jax.random.normal(kw_, (ksize, ksize, cin, cout), jnp.float32) * 0.1
    b = 0.1 * jax.random.normal(kb, (cout,), jnp.float32)
    return w, b


def make_ssd_params(key, in_channels, backbone_feature_filters, trans_filters,
                    classes, anchors_per_location):
    keys = jax.random.split(key, 64)
    k = iter(keys)
    params = {}

    # Synthetic backbone: one conv3x3/s2 + BN + ReLU per backbone feature map.
    bb = []
    cin = in_channels
    for cout in backbone_feature_filters:
        bb.append(_make_conv_bn(next(k), cin, cout, 3))
        cin = cout
    params["backbone"] = bb

    # feature_expand: [conv1x1+BN+ReLU, conv3x3/s2+BN+ReLU] per stage.
    fe = []
    for i, tf in enumerate(trans_filters):
        in_f = backbone_feature_filters[-1] if i == 0 else trans_filters[i - 1]
        fe.append({
            "c1": _make_conv_bn(next(k), in_f, tf, 1),
            "c2": _make_conv_bn(next(k), tf, tf, 3),
        })
    params["feature_expand"] = fe

    # Fused predictor heads: class (classes+1) and box (4*anchors) conv weights
    # are concatenated along the output-channel axis -> one conv per feature.
    in_filters = list(backbone_feature_filters) + list(trans_filters)
    heads = []
    for f in in_filters:
        cw, cb = _make_conv_bias(next(k), f, classes + 1, 3)
        bw, bb_ = _make_conv_bias(next(k), f, 4 * anchors_per_location, 3)
        heads.append((jnp.concatenate([cw, bw], axis=-1).astype(jnp.bfloat16),
                      jnp.concatenate([cb, bb_], axis=0)))
    params["heads"] = heads
    return params


# ----------------------------------------------------------------------------
# SSD forward
# ----------------------------------------------------------------------------
def ssd_forward(x_nchw, params, classes, anchors_per_location):
    x = jnp.transpose(x_nchw, (0, 2, 3, 1)).astype(jnp.bfloat16)  # NCHW -> NHWC

    # Synthetic backbone (stand-in for the torch.load()'d backbone).
    features = []
    y = x
    for (w, b) in params["backbone"]:
        y = conv3x3(y, w, b, stride=2, relu=True, out_dtype=jnp.bfloat16)
        features.append(y)

    # feature_expand
    for fe in params["feature_expand"]:
        w1, b1 = fe["c1"]
        y = conv1x1(y, w1, b1, relu=True, out_dtype=jnp.bfloat16)
        w2, b2 = fe["c2"]
        y = conv3x3(y, w2, b2, stride=2, relu=True, out_dtype=jnp.bfloat16)
        features.append(y)

    # fused class+box predictor heads (one conv per feature map)
    n_cls = classes + 1
    n_box = 4 * anchors_per_location
    cls_list, box_list = [], []
    for feat, (hw, hb) in zip(features, params["heads"]):
        cb = conv3x3(feat, hw, hb, stride=1, relu=False, out_dtype=jnp.float32)
        n, h, wsp, _ = cb.shape
        c = cb[..., :n_cls]
        bx = cb[..., n_cls:]
        # match PyTorch (N, C, H, W).view(N, C, -1)
        cls_list.append(jnp.transpose(c, (0, 3, 1, 2)).reshape(n, n_cls, h * wsp))
        box_list.append(jnp.transpose(bx, (0, 3, 1, 2)).reshape(n, n_box, h * wsp))

    cls_preds = jnp.concatenate(cls_list, axis=2)
    box_preds = jnp.concatenate(box_list, axis=2)
    return jnp.concatenate([cls_preds, box_preds], axis=1)


# ----------------------------------------------------------------------------
if __name__ == "__main__":
    # Small, shape-consistent config.
    batch, in_channels, spatial = 2, 4, 16
    backbone_feature_filters = [8, 16]
    trans_filters = [16, 16]
    classes, anchors = 1, 1

    key = jax.random.PRNGKey(0)
    k_in, k_par = jax.random.split(key)
    x = jax.random.normal(
        k_in, (batch, in_channels, spatial, spatial), jnp.float32)  # NCHW

    params = make_ssd_params(k_par, in_channels, backbone_feature_filters,
                             trans_filters, classes, anchors)

    out = ssd_forward(x, params, classes, anchors)
    out = jax.block_until_ready(out)

    # feature map sizes: 8x8, 4x4, 2x2, 1x1 -> 85 locations;
    # channels: (classes+1) + 4*anchors = 6
    assert out.shape == (batch, (classes + 1) + 4 * anchors, 85), out.shape
    assert jnp.all(jnp.isfinite(out))
    print("KERNEL_OK")
</pallas_src>

<mosaic_0001>
module attributes {stable_mosaic.version = 11 : i64} {
  func.func @_conv3x3_kernel(%arg0: i32, %arg1: memref<1x18x18x4xbf16, #tpu.memory_space<vmem>>, %arg2: memref<3x3x4x8xbf16, #tpu.memory_space<vmem>>, %arg3: memref<1x8xf32, #tpu.memory_space<vmem>>, %arg4: memref<1x8x16x8xbf16, #tpu.memory_space<vmem>>) attributes {dimension_semantics = [#tpu.dimension_semantics<parallel>], iteration_bounds = array<i64: 2>, scalar_prefetch = 0 : i64, scratch_operands = 0 : i64, tpu.core_type = #tpu.core_type<tc>, window_params = [{transform_indices = @transform_0, window_bounds = array<i64: 1, 18, 18, 4>}, {pipeline_mode = #tpu.pipeline_mode<synchronous>, transform_indices = @transform_1, window_bounds = array<i64: 3, 3, 4, 8>}, {pipeline_mode = #tpu.pipeline_mode<synchronous>, transform_indices = @transform_2, window_bounds = array<i64: 1, 8>}, {transform_indices = @transform_3, window_bounds = array<i64: 1, 8, 16, 8>}]} {
    %c0 = arith.constant 0 : index
    %c0_0 = arith.constant 0 : index
    %0 = vector.load %arg3[%c0, %c0_0] : memref<1x8xf32, #tpu.memory_space<vmem>>, vector<1x8xf32>
    %c0_i32 = arith.constant 0 : i32
    %c8_i32 = arith.constant 8 : i32
    %1 = arith.addi %c0_i32, %c8_i32 : i32
    %c1_i32 = arith.constant 1 : i32
    scf.for %arg5 = %c0_i32 to %1 step %c1_i32  : i32 {
      %c1_i32_2 = arith.constant 1 : i32
      %2 = arith.muli %arg5, %c1_i32_2 : i32
      %c0_i32_3 = arith.constant 0 : i32
      %3 = arith.addi %c0_i32_3, %2 : i32
      %c2_i32 = arith.constant 2 : i32
      %4 = arith.muli %c2_i32, %3 : i32
      %cst = arith.constant 0.000000e+00 : f32
      %5 = vector.broadcast %cst : f32 to vector<16x8xf32>
      %c0_i32_4 = arith.constant 0 : i32
      %6 = arith.addi %4, %c0_i32_4 : i32
      %c0_5 = arith.constant 0 : index
      %7 = arith.index_cast %6 : i32 to index
      %c0_6 = arith.constant 0 : index
      %c0_7 = arith.constant 0 : index
      %8 = vector.load %arg1[%c0_5, %7, %c0_6, %c0_7] : memref<1x18x18x4xbf16, #tpu.memory_space<vmem>>, vector<1x1x18x4xbf16>
      %9 = vector.shape_cast %8 : vector<1x1x18x4xbf16> to vector<18x4xbf16>
      %10 = vector.extract_strided_slice %9 {offsets = [0, 0], sizes = [16, 4], strides = [1, 1]} : vector<18x4xbf16> to vector<16x4xbf16>
      %c0_8 = arith.constant 0 : index
      %c0_9 = arith.constant 0 : index
      %c0_10 = arith.constant 0 : index
      %c0_11 = arith.constant 0 : index
      %11 = vector.load %arg2[%c0_8, %c0_9, %c0_10, %c0_11] : memref<3x3x4x8xbf16, #tpu.memory_space<vmem>>, vector<1x1x4x8xbf16>
      %12 = vector.shape_cast %11 : vector<1x1x4x8xbf16> to vector<4x8xbf16>
      %cst_12 = arith.constant dense<0.000000e+00> : vector<16x8xf32>
      %13 = tpu.matmul %10, %12, %cst_12 {dimension_numbers = #tpu.dot_dimension_numbers<[1], [0], [0], [1], [0, 0, 1, 1], [], []>} : vector<16x4xbf16>, vector<4x8xbf16>, vector<16x8xf32> -> vector<16x8xf32>
      %14 = arith.addf %5, %13 : vector<16x8xf32>
      %15 = vector.extract_strided_slice %9 {offsets = [1, 0], sizes = [16, 4], strides = [1, 1]} : vector<18x4xbf16> to vector<16x4xbf16>
      %c0_13 = arith.constant 0 : index
      %c1 = arith.constant 1 : index
      %c0_14 = arith.constant 0 : index
      %c0_15 = arith.constant 0 : index
      %16 = vector.load %arg2[%c0_13, %c1, %c0_14, %c0_15] : memref<3x3x4x8xbf16, #tpu.memory_space<vmem>>, vector<1x1x4x8xbf16>
      %17 = vector.shape_cast %16 : vector<1x1x4x8xbf16> to vector<4x8xbf16>
      %cst_16 = arith.constant dense<0.000000e+00> : vector<16x8xf32>
      %18 = tpu.matmul %15, %17, %cst_16 {dimension_numbers = #tpu.dot_dimension_numbers<[1], [0], [0], [1], [0, 0, 1, 1], [], []>} : vector<16x4xbf16>, vector<4x8xbf16>, vector<16x8xf32> -> vector<16x8xf32>
      %19 = arith.addf %14, %18 : vector<16x8xf32>
      %20 = vector.extract_strided_slice %9 {offsets = [2, 0], sizes = [16, 4], strides = [1, 1]} : vector<18x4xbf16> to vector<16x4xbf16>
      %c0_17 = arith.constant 0 : index
      %c2 = arith.constant 2 : index
      %c0_18 = arith.constant 0 : index
      %c0_19 = arith.constant 0 : index
      %21 = vector.load %arg2[%c0_17, %c2, %c0_18, %c0_19] : memref<3x3x4x8xbf16, #tpu.memory_space<vmem>>, vector<1x1x4x8xbf16>
      %22 = vector.shape_cast %21 : vector<1x1x4x8xbf16> to vector<4x8xbf16>
      %cst_20 = arith.constant dense<0.000000e+00> : vector<16x8xf32>
      %23 = tpu.matmul %20, %22, %cst_20 {dimension_numbers = #tpu.dot_dimension_numbers<[1], [0], [0], [1], [0, 0, 1, 1], [], []>} : vector<16x4xbf16>, vector<4x8xbf16>, vector<16x8xf32> -> vector<16x8xf32>
      %24 = arith.addf %19, %23 : vector<16x8xf32>
      %c1_i32_21 = arith.constant 1 : i32
      %25 = arith.addi %4, %c1_i32_21 : i32
      %c0_22 = arith.constant 0 : index
      %26 = arith.index_cast %25 : i32 to index
      %c0_23 = arith.constant 0 : index
      %c0_24 = arith.constant 0 : index
      %27 = vector.load %arg1[%c0_22, %26, %c0_23, %c0_24] : memref<1x18x18x4xbf16, #tpu.memory_space<vmem>>, vector<1x1x18x4xbf16>
      %28 = vector.shape_cast %27 : vector<1x1x18x4xbf16> to vector<18x4xbf16>
      %29 = vector.extract_strided_slice %28 {offsets = [0, 0], sizes = [16, 4], strides = [1, 1]} : vector<18x4xbf16> to vector<16x4xbf16>
      %c1_25 = arith.constant 1 : index
      %c0_26 = arith.constant 0 : index
      %c0_27 = arith.constant 0 : index
      %c0_28 = arith.constant 0 : index
      %30 = vector.load %arg2[%c1_25, %c0_26, %c0_27, %c0_28] : memref<3x3x4x8xbf16, #tpu.memory_space<vmem>>, vector<1x1x4x8xbf16>
      %31 = vector.shape_cast %30 : vector<1x1x4x8xbf16> to vector<4x8xbf16>
      %cst_29 = arith.constant dense<0.000000e+00> : vector<16x8xf32>
      %32 = tpu.matmul %29, %31, %cst_29 {dimension_numbers = #tpu.dot_dimension_numbers<[1], [0], [0], [1], [0, 0, 1, 1], [], []>} : vector<16x4xbf16>, vector<4x8xbf16>, vector<16x8xf32> -> vector<16x8xf32>
      %33 = arith.addf %24, %32 : vector<16x8xf32>
      %34 = vector.extract_strided_slice %28 {offsets = [1, 0], sizes = [16, 4], strides = [1, 1]} : vector<18x4xbf16> to vector<16x4xbf16>
      %c1_30 = arith.constant 1 : index
      %c1_31 = arith.constant 1 : index
      %c0_32 = arith.constant 0 : index
      %c0_33 = arith.constant 0 : index
      %35 = vector.load %arg2[%c1_30, %c1_31, %c0_32, %c0_33] : memref<3x3x4x8xbf16, #tpu.memory_space<vmem>>, vector<1x1x4x8xbf16>
      %36 = vector.shape_cast %35 : vector<1x1x4x8xbf16> to vector<4x8xbf16>
      %cst_34 = arith.constant dense<0.000000e+00> : vector<16x8xf32>
      %37 = tpu.matmul %34, %36, %cst_34 {dimension_numbers = #tpu.dot_dimension_numbers<[1], [0], [0], [1], [0, 0, 1, 1], [], []>} : vector<16x4xbf16>, vector<4x8xbf16>, vector<16x8xf32> -> vector<16x8xf32>
      %38 = arith.addf %33, %37 : vector<16x8xf32>
      %39 = vector.extract_strided_slice %28 {offsets = [2, 0], sizes = [16, 4], strides = [1, 1]} : vector<18x4xbf16> to vector<16x4xbf16>
      %c1_35 = arith.constant 1 : index
      %c2_36 = arith.constant 2 : index
      %c0_37 = arith.constant 0 : index
      %c0_38 = arith.constant 0 : index
      %40 = vector.load %arg2[%c1_35, %c2_36, %c0_37, %c0_38] : memref<3x3x4x8xbf16, #tpu.memory_space<vmem>>, vector<1x1x4x8xbf16>
      %41 = vector.shape_cast %40 : vector<1x1x4x8xbf16> to vector<4x8xbf16>
      %cst_39 = arith.constant dense<0.000000e+00> : vector<16x8xf32>
      %42 = tpu.matmul %39, %41, %cst_39 {dimension_numbers = #tpu.dot_dimension_numbers<[1], [0], [0], [1], [0, 0, 1, 1], [], []>} : vector<16x4xbf16>, vector<4x8xbf16>, vector<16x8xf32> -> vector<16x8xf32>
      %43 = arith.addf %38, %42 : vector<16x8xf32>
      %c2_i32_40 = arith.constant 2 : i32
      %44 = arith.addi %4, %c2_i32_40 : i32
      %c0_41 = arith.constant 0 : index
      %45 = arith.index_cast %44 : i32 to index
      %c0_42 = arith.constant 0 : index
      %c0_43 = arith.constant 0 : index
      %46 = vector.load %arg1[%c0_41, %45, %c0_42, %c0_43] : memref<1x18x18x4xbf16, #tpu.memory_space<vmem>>, vector<1x1x18x4xbf16>
      %47 = vector.shape_cast %46 : vector<1x1x18x4xbf16> to vector<18x4xbf16>
      %48 = vector.extract_strided_slice %47 {offsets = [0, 0], sizes = [16, 4], strides = [1, 1]} : vector<18x4xbf16> to vector<16x4xbf16>
      %c2_44 = arith.constant 2 : index
      %c0_45 = arith.constant 0 : index
      %c0_46 = arith.constant 0 : index
      %c0_47 = arith.constant 0 : index
      %49 = vector.load %arg2[%c2_44, %c0_45, %c0_46, %c0_47] : memref<3x3x4x8xbf16, #tpu.memory_space<vmem>>, vector<1x1x4x8xbf16>
      %50 = vector.shape_cast %49 : vector<1x1x4x8xbf16> to vector<4x8xbf16>
      %cst_48 = arith.constant dense<0.000000e+00> : vector<16x8xf32>
      %51 = tpu.matmul %48, %50, %cst_48 {dimension_numbers = #tpu.dot_dimension_numbers<[1], [0], [0], [1], [0, 0, 1, 1], [], []>} : vector<16x4xbf16>, vector<4x8xbf16>, vector<16x8xf32> -> vector<16x8xf32>
      %52 = arith.addf %43, %51 : vector<16x8xf32>
      %53 = vector.extract_strided_slice %47 {offsets = [1, 0], sizes = [16, 4], strides = [1, 1]} : vector<18x4xbf16> to vector<16x4xbf16>
      %c2_49 = arith.constant 2 : index
      %c1_50 = arith.constant 1 : index
      %c0_51 = arith.constant 0 : index
      %c0_52 = arith.constant 0 : index
      %54 = vector.load %arg2[%c2_49, %c1_50, %c0_51, %c0_52] : memref<3x3x4x8xbf16, #tpu.memory_space<vmem>>, vector<1x1x4x8xbf16>
      %55 = vector.shape_cast %54 : vector<1x1x4x8xbf16> to vector<4x8xbf16>
      %cst_53 = arith.constant dense<0.000000e+00> : vector<16x8xf32>
      %56 = tpu.matmul %53, %55, %cst_53 {dimension_numbers = #tpu.dot_dimension_numbers<[1], [0], [0], [1], [0, 0, 1, 1], [], []>} : vector<16x4xbf16>, vector<4x8xbf16>, vector<16x8xf32> -> vector<16x8xf32>
      %57 = arith.addf %52, %56 : vector<16x8xf32>
      %58 = vector.extract_strided_slice %47 {offsets = [2, 0], sizes = [16, 4], strides = [1, 1]} : vector<18x4xbf16> to vector<16x4xbf16>
      %c2_54 = arith.constant 2 : index
      %c2_55 = arith.constant 2 : index
      %c0_56 = arith.constant 0 : index
      %c0_57 = arith.constant 0 : index
      %59 = vector.load %arg2[%c2_54, %c2_55, %c0_56, %c0_57] : memref<3x3x4x8xbf16, #tpu.memory_space<vmem>>, vector<1x1x4x8xbf16>
      %60 = vector.shape_cast %59 : vector<1x1x4x8xbf16> to vector<4x8xbf16>
      %cst_58 = arith.constant dense<0.000000e+00> : vector<16x8xf32>
      %61 = tpu.matmul %58, %60, %cst_58 {dimension_numbers = #tpu.dot_dimension_numbers<[1], [0], [0], [1], [0, 0, 1, 1], [], []>} : vector<16x4xbf16>, vector<4x8xbf16>, vector<16x8xf32> -> vector<16x8xf32>
      %62 = arith.addf %57, %61 : vector<16x8xf32>
      %63 = vector.broadcast %0 : vector<1x8xf32> to vector<16x8xf32>
      %64 = arith.addf %62, %63 : vector<16x8xf32>
      %cst_59 = arith.constant 0.000000e+00 : f32
      %65 = vector.broadcast %cst_59 : f32 to vector<16x8xf32>
      %66 = arith.maximumf %64, %65 : vector<16x8xf32>
      %67 = arith.truncf %66 : vector<16x8xf32> to vector<16x8xbf16>
      %c0_60 = arith.constant 0 : index
      %68 = arith.index_cast %3 : i32 to index
      %c0_61 = arith.constant 0 : index
      %c0_62 = arith.constant 0 : index
      %69 = vector.load %arg4[%c0_60, %68, %c0_61, %c0_62] : memref<1x8x16x8xbf16, #tpu.memory_space<vmem>>, vector<1x1x16x8xbf16>
      %70 = vector.shape_cast %69 : vector<1x1x16x8xbf16> to vector<16x8xbf16>
      %71 = vector.shape_cast %67 : vector<16x8xbf16> to vector<1x1x16x8xbf16>
      tpu.vector_store %arg4[%c0_60, %68, %c0_61, %c0_62], %71 {strides = array<i32>} : memref<1x8x16x8xbf16, #tpu.memory_space<vmem>>, vector<1x1x16x8xbf16>,
    }
    %c8_i32_1 = arith.constant 8 : i32
    return
  }
  func.func @transform_0(%arg0: i32) -> (i32, i32, i32, i32) {
    %c0_i32 = arith.constant 0 : i32
    %c0_i32_0 = arith.constant 0 : i32
    %c0_i32_1 = arith.constant 0 : i32
    %c0_i32_2 = arith.constant 0 : i32
    return %arg0, %c0_i32, %c0_i32_0, %c0_i32_1 : i32, i32, i32, i32
  }
  func.func @transform_1(%arg0: i32) -> (i32, i32, i32, i32) {
    %c0_i32 = arith.constant 0 : i32
    %c0_i32_0 = arith.constant 0 : i32
    %c0_i32_1 = arith.constant 0 : i32
    %c0_i32_2 = arith.constant 0 : i32
    %c0_i32_3 = arith.constant 0 : i32
    return %c0_i32, %c0_i32_0, %c0_i32_1, %c0_i32_2 : i32, i32, i32, i32
  }
  func.func @transform_2(%arg0: i32) -> (i32, i32) {
    %c0_i32 = arith.constant 0 : i32
    %c0_i32_0 = arith.constant 0 : i32
    %c0_i32_1 = arith.constant 0 : i32
    return %c0_i32, %c0_i32_0 : i32, i32
  }
  func.func @transform_3(%arg0: i32) -> (i32, i32, i32, i32) {
    %c0_i32 = arith.constant 0 : i32
    %c0_i32_0 = arith.constant 0 : i32
    %c0_i32_1 = arith.constant 0 : i32
    %c0_i32_2 = arith.constant 0 : i32
    return %arg0, %c0_i32, %c0_i32_0, %c0_i32_1 : i32, i32, i32, i32
  }
}

</mosaic_0001>

<bundles_post_ra>
// kernel: tpu_custom_call.1
= control target key start
LH: loop header
LB: loop body
LE: loop exit
PB: predicated region body
PF: predicated region fallthrough
CT: control target
= control target key end

     0   :  { %s1009_s12 = smov 0   ;;  %s1135_s0 = inlined_call_operand.vmem [shape: bf16[2,18,18,4], index: 0, kind: input, shape index: {}]   ;;  %s1136_s1 = inlined_call_operand.vmem [shape: bf16[3,3,4,8], index: 1, kind: input, shape index: {}]   ;;  %s1137_s2 = inlined_call_operand.vmem [shape: f32[1,8], index: 2, kind: input, shape index: {}]   ;;  %s1138_s3 = inlined_call_operand.vmem [shape: bf16[2,8,16,8], index: 3, kind: output, shape index: {}]  }
   0x1 LB: > { %s819_s13 = sadd.s32 4294967295, %s981_s12   ;;  %p823_p0 = scmp.ge.s32.totalorder %s981_s12, 1  ;;  %s981_s12 = sphi %s1009_s12, %s13_s12  }
   0x2   : > { %p137_p1 = scmp.lt.s32.totalorder %s981_s12, 3 }
   0x4   : > { %p138_p2 = pnand %p823_p0, %p137_p1 }
   0x5   : > { %p161_p3 = scmp.lt.s32.totalorder (!%p138_p2), %s819_s13, 1  ;;  %v1020_v0 = vld [vmem:[%s1137_s2] ss:$0 sm:$0xff] (!%p138_p2)  ;;  %s1032_s24 = smov (!%p138_p2), 0  }
   0x6   : > { %141 = sbr.rel (%p138_p2) target bundleno = 284 (0x11c), region = 32 }
   0xd   : > { %s1140_s13 = smov (!%p161_p3, %s819_s13), 1 }
   0xe   : > { %s946_s16 = smul.u32 216, %s1140_s13  ;;  %s869_s17 = sshll.u32 %s1140_s13, 6 }
   0xf   : > { %s1025_s20 = scalar_lea.vmem %s1138_s3, %s869_s17 }
  0x10   : > { %s1030_s23 = scalar_lea.vmem %s1135_s0, %s946_s16 }
  0x11 LB: >> { %v830_v1 = vld [vmem:[%s1136_s1 + $0x2] sm:$0x3]  ;;  %vm214_vm0 = vcmask 1041408   ;;  %v186_v2 = vld [vmem:[%s1136_s1] sm:$0x3]  ;;  %v987_v3 = vmov 0.0   ;;  %s985_s24 = sphi %s1032_s24, %s178_s24  }
  0x12   : >> { %892 = vmatprep.subr.bf16.mxu0 %v987_v3  ;;  %v216_v4 = vsel %vm214_vm0, %v830_v1, 0  ;;  %898 = vmatprep.subr.bf16.mxu1 %v987_v3  ;;  %v262_v5 = vsel %vm214_vm0, %v186_v2, 0  ;;  %s870_s29 = smul.u32 24, %s985_s24  ;;  %v842_v6 = vld [vmem:[%s1136_s1 + $0x6] sm:$0x3]  ;;  %vm988_vm1 = vmmov 0  }
  0x13   : >> { %893 = vmatpush3.bf16.msra.mxu0 %v216_v4  ;;  %899 = vmatpush3.bf16.msra.mxu1 %v262_v5  ;;  %vm210_vm2 = vcmask 31744   ;;  %v378_v7 = vsel %vm214_vm0, %v842_v6, 0  ;;  %v835_v15 = vld [vmem:[%s1136_s1 + $0x4] sm:$0x3]  ;;  %vm197_vm3 = vsmask.f32 7424 }
  0x14   : >> { %894 = vmatprep.mubr.msk.bf16.mxu0 %vm988_vm1, %v987_v3  ;;  %900 = vmatprep.mubr.msk.bf16.mxu1 %vm988_vm1, %v987_v3  ;;  %s1057_s5 = scalar_lea.vmem %s1030_s23, %s870_s29  ;;  %v848_v18 = vld [vmem:[%s1136_s1 + $0xa] sm:$0x3]  ;;  %v315_v19 = vsel %vm214_vm0, %v835_v15, 0  ;;  %vm307_vm4 = vcmask 1046528   ;;  %v845_v27 = vld [vmem:[%s1136_s1 + $0x8] sm:$0x3] }
  0x15   : >> { %904 = vmatprep.subr.bf16.mxu0 %v987_v3  ;;  %910 = vmatprep.subr.bf16.mxu1 %v987_v3  ;;  %v965_v8 = vld [vmem:[%s1057_s5] sm:$0xff]   ;;  %v966_v9 = vld [vmem:[%s1057_s5 + $0x8] ss:$0 sps:$4 sm:$0x11]   ;;  %v967_v17 = vld [vmem:[%s1057_s5 + $0xc] sm:$0xff]   ;;  %v497_v22 = vsel %vm214_vm0, %v848_v18, 0 }
  0x16   : >> { %v199_v10 = vshrl.u32 %v965_v8, 16  ;;  %v201_v11 = vshll.u32 %v965_v8, 16  ;;  %v206_v12 = vshll.u32 %v966_v9, 16  ;;  %901 = vmatmul.mubr.msk.bf16.vlgmr.msra.gmra.mrb[0].mxu1 %vm210_vm2, %v965_v8  ;;  %v969_v21 = vld [vmem:[%s1057_s5 + $0x18] sm:$0xff]   ;;  %v308_v23 = vrot.slane %v965_v8, 1  ;;  %s873_s19 = sshll.u32 %s985_s24, 3 }
  0x17   : >> { %911 = vmatpush3.bf16.msra.mxu1 %v378_v7  ;;  %912 = vmatprep.mubr.msk.bf16.mxu1 %vm988_vm1, %v987_v3  ;;  %v309_v24 = vrot.slane %v966_v9, 1  ;;  %v968_v25 = vld [vmem:[%s1057_s5 + $0x14] ss:$0 sps:$4 sm:$0x11]   ;;  %v430_v26 = vshll.u32 %v967_v17, 16  ;;  %v490_v28 = vrot.slane %v967_v17, 1  ;;  %s743_s21 = scalar_lea.vmem %s1025_s20, %s873_s19 }
  0x18   : >> { %v203_v13 = vrot.slane %v201_v11, 1  ;;  %v208_v14 = vrot.slane %v206_v12, 1  ;;  %922 = vmatprep.subr.bf16.mxu1 %v987_v3  ;;  %v491_v29 = vrot.slane %v968_v25, 1  ;;  %v970_v30 = vld [vmem:[%s1057_s5 + $0x20] ss:$0 sps:$4 sm:$0x11]  }
  0x19   : >> { %v612_v31 = vshll.u32 %v969_v21, 16  ;;  %v310_v32 = vsel %vm307_vm4, %v308_v23, %v309_v24  ;;  %v428_v33 = vshrl.u32 %v967_v17, 16  ;;  %v432_v34 = vrot.slane %v430_v26, 1  ;;  %v858_v36 = vld [vmem:[%s1136_s1 + $0xe] sm:$0x3]  ;;  %s178_s24 = sadd.s32 1, %s985_s24  }
  0x1a   : >> { %v204_v16 = vor.u32 %v203_v13, %v199_v10  ;;  %v435_v35 = vshll.u32 %v968_v25, 16  ;;  %v443_v37 = vsel %vm214_vm0, %v845_v27, 0  ;;  %v492_v38 = vsel %vm307_vm4, %v490_v28, %v491_v29  ;;  %v855_v45 = vld [vmem:[%s1136_s1 + $0xc] sm:$0x3]  ;;  %v861_v51 = vld [vmem:[%s1136_s1 + $0x10] sm:$0x3] }
  0x1b   : >> { %v610_v39 = vshrl.u32 %v969_v21, 16  ;;  %v614_v40 = vrot.slane %v612_v31, 1  ;;  %v617_v41 = vshll.u32 %v970_v30, 16  ;;  %v625_v42 = vsel %vm214_vm0, %v858_v36, 0  ;;  %p175_p4 = scmp.ge.s32.totalorder %s178_s24, 8  }
  0x1c   : >> { %v209_v20 = vsel %vm197_vm3, %v204_v16, %v208_v14  ;;  %v433_v43 = vor.u32 %v432_v34, %v428_v33  ;;  %v437_v44 = vrot.slane %v435_v35, 1  ;;  %v560_v49 = vsel %vm214_vm0, %v855_v45, 0 }
  0x1d   : >> { %895 = vmatmul.mubr.msk.bf16.vlgmr.msra.gmra.mrb[0].mxu0 %vm210_vm2, %v209_v20  ;;  %v615_v46 = vor.u32 %v614_v40, %v610_v39  ;;  %v619_v47 = vrot.slane %v617_v41, 1  ;;  %v679_v52 = vsel %vm214_vm0, %v861_v51, 0  ;;  %v672_v53 = vrot.slane %v969_v21, 1 }
  0x1e   : >> { %905 = vmatpush3.bf16.msra.mxu0 %v315_v19  ;;  %906 = vmatprep.mubr.msk.bf16.mxu0 %vm988_vm1, %v987_v3  ;;  %v438_v48 = vsel %vm197_vm3, %v433_v43, %v437_v44  ;;  %v673_v54 = vrot.slane %v970_v30, 1  ;;  %vm744_vm5 = vcmask 60416  }
  0x1f   : >> { %916 = vmatprep.subr.bf16.mxu0 %v987_v3  ;;  %913 = vmatmul.mubr.msk.bf16.vlgmr.msra.gmra.mrb[4].mxu1 %vm210_vm2, %v967_v17  ;;  %v620_v50 = vsel %vm197_vm3, %v615_v46, %v619_v47 }
  0x20   : >> { %923 = vmatpush3.bf16.msra.mxu1 %v497_v22  ;;  %924 = vmatprep.mubr.msk.bf16.mxu1 %vm988_vm1, %v987_v3  ;;  %v674_v55 = vsel %vm307_vm4, %v672_v53, %v673_v54 }
  0x21   : >> { %934 = vmatprep.subr.bf16.mxu1 %v987_v3 }
  0x25   : >> { %907 = vmatmul.mubr.msk.bf16.vlgmr.msra.gmra.mrb[4].mxu0 %vm210_vm2, %v310_v32 }
  0x26   : >> { %917 = vmatpush3.bf16.msra.mxu0 %v443_v37  ;;  %918 = vmatprep.mubr.msk.bf16.mxu0 %vm988_vm1, %v987_v3 }
  0x27   : >> { %928 = vmatprep.subr.bf16.mxu0 %v987_v3  ;;  %925 = vmatmul.mubr.msk.bf16.vlgmr.msra.gmra.mrb[8].mxu1 %vm210_vm2, %v492_v38 }
  0x28   : >> { %935 = vmatpush3.bf16.msra.mxu1 %v625_v42  ;;  %936 = vmatprep.mubr.msk.bf16.mxu1 %vm988_vm1, %v987_v3 }
  0x2d   : >> { %919 = vmatmul.mubr.msk.bf16.vlgmr.msra.gmra.mrb[8].mxu0 %vm210_vm2, %v438_v48 }
  0x2e   : >> { %929 = vmatpush3.bf16.msra.mxu0 %v560_v49  ;;  %930 = vmatprep.mubr.msk.bf16.mxu0 %vm988_vm1, %v987_v3 }
  0x2f   : >> { %940 = vmatprep.subr.bf16.mxu0 %v987_v3  ;;  %937 = vmatmul.mubr.msk.bf16.vlgmr.msra.gmra.mrb[12].mxu1 %vm210_vm2, %v620_v50 }
  0x35   : >> { %931 = vmatmul.mubr.msk.bf16.vlgmr.msra.gmra.mrb[12].mxu0 %vm210_vm2, %v969_v21 }
  0x36   : >> { %941 = vmatpush3.bf16.msra.mxu0 %v679_v52  ;;  %942 = vmatprep.mubr.msk.bf16.mxu0 %vm988_vm1, %v987_v3 }
  0x3d   : >> { %943 = vmatmul.mubr.msk.bf16.vlgmr.msra.gmra.mrb[16].mxu0 %vm210_vm2, %v674_v55 }
  0xe9   : >> { %v298_v56 = vpop.f32.mrb[0].mxu1 }
  0xea   : >> { %v902_v57 = vpop.f32.mrb[1].mxu1 }
  0xeb   : >> { %v301_v58 = vpop.f32.mrb[2].mxu1 }
  0xec   : >> { %v903_v59 = vpop.f32.mrb[3].mxu1 }
  0xf0   : >> { %v252_v60 = vpop.f32.mrb[0].mxu0 }
  0xf1   : >> { %v299_v61 = vadd.f32 %v298_v56, %v252_v60  ;;  %v896_v62 = vpop.f32.mrb[1].mxu0 }
  0xf2   : >> { %v255_v63 = vpop.f32.mrb[2].mxu0  ;;  %v414_v1 = vpop.f32.mrb[4].mxu1 }
  0xf3   : >> { %v302_v2 = vadd.f32 %v301_v58, %v255_v63  ;;  %v897_v4 = vpop.f32.mrb[3].mxu0  ;;  %v914_v5 = vpop.f32.mrb[5].mxu1 }
  0xf4   : >> { %v417_v6 = vpop.f32.mrb[6].mxu1 }
  0xf5   : >> { %v915_v3 = vpop.f32.mrb[7].mxu1 }
  0xf8   : >> { %v351_v7 = vpop.f32.mrb[4].mxu0 }
  0xf9   : >> { %v358_v8 = vadd.f32 %v351_v7, %v299_v61  ;;  %v908_v9 = vpop.f32.mrb[5].mxu0 }
  0xfa   : >> { %v354_v10 = vpop.f32.mrb[6].mxu0  ;;  %v533_v11 = vpop.f32.mrb[8].mxu1 }
  0xfb   : >> { %v359_v12 = vadd.f32 %v354_v10, %v302_v2  ;;  %v421_v13 = vadd.f32 %v414_v1, %v358_v8  ;;  %v909_v14 = vpop.f32.mrb[7].mxu0  ;;  %v926_v15 = vpop.f32.mrb[9].mxu1 }
  0xfc   : >> { %v536_v16 = vpop.f32.mrb[10].mxu1 }
  0xfd   : >> { %v422_v17 = vadd.f32 %v417_v6, %v359_v12  ;;  %v927_v18 = vpop.f32.mrb[11].mxu1 }
 0x100   : >> { %v479_v19 = vpop.f32.mrb[8].mxu0 }
 0x101   : >> { %v486_v20 = vadd.f32 %v479_v19, %v421_v13  ;;  %v920_v21 = vpop.f32.mrb[9].mxu0 }
 0x102   : >> { %v482_v22 = vpop.f32.mrb[10].mxu0  ;;  %v661_v23 = vpop.f32.mrb[12].mxu1 }
 0x103   : >> { %v487_v24 = vadd.f32 %v482_v22, %v422_v17  ;;  %v540_v25 = vadd.f32 %v533_v11, %v486_v20  ;;  %v921_v26 = vpop.f32.mrb[11].mxu0  ;;  %v938_v27 = vpop.f32.mrb[13].mxu1 }
 0x104   : >> { %v664_v28 = vpop.f32.mrb[14].mxu1 }
 0x105   : >> { %v541_v29 = vadd.f32 %v536_v16, %v487_v24  ;;  %v939_v30 = vpop.f32.mrb[15].mxu1 }
 0x108   : >> { %v596_v31 = vpop.f32.mrb[12].mxu0 }
 0x109   : >> { %v603_v32 = vadd.f32 %v596_v31, %v540_v25  ;;  %v932_v33 = vpop.f32.mrb[13].mxu0 }
 0x10a   : >> { %v599_v34 = vpop.f32.mrb[14].mxu0 }
 0x10b   : >> { %v604_v35 = vadd.f32 %v599_v34, %v541_v29  ;;  %v668_v36 = vadd.f32 %v661_v23, %v603_v32  ;;  %v933_v37 = vpop.f32.mrb[15].mxu0 }
 0x10d   : >> { %v669_v38 = vadd.f32 %v664_v28, %v604_v35 }
 0x110   : >> { %v715_v39 = vpop.f32.mrb[16].mxu0 }
 0x111   : >> { %v722_v40 = vadd.f32 %v715_v39, %v668_v36  ;;  %v944_v41 = vpop.f32.mrb[17].mxu0 }
 0x112   : >> { %v718_v42 = vpop.f32.mrb[18].mxu0 }
 0x113   : >> { %v730_v43 = vadd.f32 %v1020_v0, %v722_v40  ;;  %v723_v44 = vadd.f32 %v718_v42, %v669_v38  ;;  %v945_v45 = vpop.f32.mrb[19].mxu0 }
 0x115   : >> { %v732_v46 = vmax.f32 %v730_v43, 0.0  ;;  %v731_v47 = vadd.f32 %v1020_v0, %v723_v44  ;;  %177 = sbr.rel (!%p175_p4) target bundleno = 17 (0x11), region = 81 }
 0x117   : >> { %v871_v48 = vpack.c.bf16 %v732_v46, %v732_v46  ;;  %v733_v49 = vmax.f32 %v731_v47, 0.0 }
 0x119   : >> { %745 = vst.msk [vmem:[%s743_s21] sm:$0xf] %vm744_vm5, %v871_v48  ;;  %v872_v50 = vpack.c.bf16 %v733_v49, %v733_v49 }
 0x11b   : >> { %746 = vst.msk [vmem:[%s743_s21 + $0x4] sm:$0xf] %vm744_vm5, %v872_v50 }
 0x11c PF: > { %s13_s12 = sadd.s32 1, %s981_s12  }
 0x11d   : > { %p10_p5 = scmp.ge.s32.totalorder %s13_s12, 4  }
 0x11f   :  { %12 = sbr.rel (!%p10_p5) target bundleno = 1 (0x1), region = 92 }

</bundles_post_ra>
